<compile_context>
chip_gen: v6e
topology: v6e:2x2x1
jax: 0.10.0
libtpu: 0.0.40
codegen_flags: <defaults>
</compile_context>

<pallas_src>
import math

import jax
import jax.numpy as jnp
from jax import lax
from jax.experimental import pallas as pl
from jax.experimental.pallas import tpu as pltpu

LEAKY_SLOPE = 0.2


def _make_fcff_kernel(n_layers, slope):
    """Fused forward kernel for an n_layers-deep fully-connected net.

    Kernel ref order: (x_ref, W0, b0, W1, b1, ..., W{n-1}, b{n-1}, o_ref)
      x_ref : (TB, d_in)         batch tile, natural layout
      Wj    : (out_j, in_j)      PyTorch nn.Linear layout (no pre-transpose)
      bj    : (out_j, 1)
      o_ref : (d_out, TB)        transposed output (lane-dense on batch)
    """

    def kernel(*refs):
        x_ref, o_ref = refs[0], refs[-1]
        wb = refs[1:-1]
        io_dtype = x_ref.dtype

        # Layer 0:  h^T = W0 @ x^T  -- contract both operands on their
        # in-feature (last) axis => transposed-RHS matmul on the MXU.
        h = lax.dot_general(
            wb[0][...], x_ref[...],
            dimension_numbers=(((1,), (1,)), ((), ())),
            preferred_element_type=jnp.float32,
        )
        h = h + wb[1][...].astype(jnp.float32)

        for j in range(1, n_layers):
            # LeakyReLU after every layer except the last (f32, single VALU max).
            h = jnp.maximum(h, slope * h)
            # Feed the next MXU matmul in the I/O dtype (bf16 stays bf16).
            h = h.astype(io_dtype)
            h = jnp.dot(wb[2 * j][...], h, preferred_element_type=jnp.float32)
            h = h + wb[2 * j + 1][...].astype(jnp.float32)

        # TODO(synk): BatchNorm1d (normalize=True) and out_nonlinearity paths are
        # not implemented; this instantiation uses normalize=False / None.
        o_ref[...] = h.astype(o_ref.dtype)

    return kernel


def fcff_forward(x, params, *, slope=LEAKY_SLOPE, block_batch=1024, interpret=False):
    """Fused FCFFNet forward.  x: [B, d_in]; params: list of (W [out,in], b [out])."""
    n_layers = len(params)
    B, d_in = x.shape
    d_out = params[-1][0].shape[0]

    # Batch tile is the lane axis of the activation/output blocks: must be a
    # multiple of 128 unless a single block covers the whole batch.
    tb = min(block_batch, B)
    if tb < B:
        tb = max(128, (tb // 128) * 128)
    grid = (pl.cdiv(B, tb),)

    operands = [x]
    in_specs = [pl.BlockSpec((tb, d_in), lambda i: (i, 0))]
    for w, b in params:
        operands += [w, b.reshape(-1, 1)]
        # Constant index maps => weights/biases fetched once, VMEM-resident.
        in_specs += [
            pl.BlockSpec(w.shape, lambda i: (0, 0)),
            pl.BlockSpec((w.shape[0], 1), lambda i: (0, 0)),
        ]

    out_t = pl.pallas_call(
        _make_fcff_kernel(n_layers, slope),
        out_shape=jax.ShapeDtypeStruct((d_out, B), x.dtype),
        grid=grid,
        in_specs=in_specs,
        out_specs=pl.BlockSpec((d_out, tb), lambda i: (0, i)),
        compiler_params=pltpu.CompilerParams(
            dimension_semantics=("parallel",),    # megacore-shard batch on v7x
            vmem_limit_bytes=32 * 1024 * 1024,    # explicit budget; safe on 64 MiB v7x
        ),
        interpret=interpret,
    )(*operands)

    # Undo the transposed (lane-dense) output layout; tiny (d_out rows) op.
    return out_t.T


def init_linear_params(key, in_features, out_features):
    """Deterministic init matching nn.Linear default (uniform +/- 1/sqrt(fan_in))."""
    kw, kb = jax.random.split(key)
    bound = 1.0 / math.sqrt(in_features)
    w = jax.random.uniform(kw, (out_features, in_features), jnp.float32,
                           minval=-bound, maxval=bound)
    b = jax.random.uniform(kb, (out_features,), jnp.float32,
                           minval=-bound, maxval=bound)
    return w, b


def reference_forward(x, params, slope=LEAKY_SLOPE):
    """Pure-JAX reference mirroring the PyTorch forward loop."""
    n = len(params)
    for j, (w, b) in enumerate(params):
        x = x @ w.T + b
        if j != n - 1:
            x = jnp.maximum(x, slope * x)
    return x


if __name__ == "__main__":
    layers = [8, 32, 32, 4]  # [d_in, hidden, hidden, d_out]

    key = jax.random.PRNGKey(0)
    kx1, kx2, *kls = jax.random.split(key, 2 + (len(layers) - 1))
    params = [init_linear_params(kls[j], layers[j], layers[j + 1])
              for j in range(len(layers) - 1)]

    # 1) Small batch (single block), tight f32 check.
    x_small = jax.random.normal(kx1, (4, layers[0]), jnp.float32)
    out_small = jax.block_until_ready(fcff_forward(x_small, params))
    ref_small = reference_forward(x_small, params)
    assert out_small.shape == (4, layers[-1])
    assert jnp.allclose(out_small, ref_small, atol=5e-5, rtol=5e-5), \
        "f32 small-batch mismatch"

    # 2) Batch-tiled path (grid > 1, masked tail block), f32.
    x_big = jax.random.normal(kx2, (300, layers[0]), jnp.float32)
    out_big = jax.block_until_ready(fcff_forward(x_big, params, block_batch=128))
    ref_big = reference_forward(x_big, params)
    assert out_big.shape == (300, layers[-1])
    assert jnp.allclose(out_big, ref_big, atol=5e-5, rtol=5e-5), \
        "f32 tiled-batch mismatch"

    # 3) bf16 inputs / f32 accumulation (the large-batch, HBM-friendly config).
    x_bf = x_big.astype(jnp.bfloat16)
    params_bf = [(w.astype(jnp.bfloat16), b.astype(jnp.bfloat16)) for w, b in params]
    out_bf = jax.block_until_ready(fcff_forward(x_bf, params_bf, block_batch=128))
    assert jnp.allclose(out_bf.astype(jnp.float32), ref_big, atol=5e-2, rtol=5e-2), \
        "bf16 path mismatch"

    print("KERNEL_OK")
</pallas_src>

<mosaic_0001>
module attributes {stable_mosaic.version = 11 : i64} {
  func.func @kernel(%arg0: i32, %arg1: memref<4x8xf32, #tpu.memory_space<vmem>>, %arg2: memref<32x8xf32, #tpu.memory_space<vmem>>, %arg3: memref<32x1xf32, #tpu.memory_space<vmem>>, %arg4: memref<32x32xf32, #tpu.memory_space<vmem>>, %arg5: memref<32x1xf32, #tpu.memory_space<vmem>>, %arg6: memref<4x32xf32, #tpu.memory_space<vmem>>, %arg7: memref<4x1xf32, #tpu.memory_space<vmem>>, %arg8: memref<4x4xf32, #tpu.memory_space<vmem>>) attributes {dimension_semantics = [#tpu.dimension_semantics<parallel>], iteration_bounds = array<i64: 1>, scalar_prefetch = 0 : i64, scratch_operands = 0 : i64, tpu.core_type = #tpu.core_type<tc>, window_params = [{transform_indices = @transform_0, window_bounds = array<i64: 4, 8>}, {pipeline_mode = #tpu.pipeline_mode<synchronous>, transform_indices = @transform_1, window_bounds = array<i64: 32, 8>}, {pipeline_mode = #tpu.pipeline_mode<synchronous>, transform_indices = @transform_2, window_bounds = array<i64: 32, 1>}, {pipeline_mode = #tpu.pipeline_mode<synchronous>, transform_indices = @transform_3, window_bounds = array<i64: 32, 32>}, {pipeline_mode = #tpu.pipeline_mode<synchronous>, transform_indices = @transform_4, window_bounds = array<i64: 32, 1>}, {pipeline_mode = #tpu.pipeline_mode<synchronous>, transform_indices = @transform_5, window_bounds = array<i64: 4, 32>}, {pipeline_mode = #tpu.pipeline_mode<synchronous>, transform_indices = @transform_6, window_bounds = array<i64: 4, 1>}, {transform_indices = @transform_7, window_bounds = array<i64: 4, 4>}]} {
    %c0 = arith.constant 0 : index
    %c0_0 = arith.constant 0 : index
    %0 = vector.load %arg2[%c0, %c0_0] : memref<32x8xf32, #tpu.memory_space<vmem>>, vector<32x8xf32>
    %c0_1 = arith.constant 0 : index
    %c0_2 = arith.constant 0 : index
    %1 = vector.load %arg1[%c0_1, %c0_2] : memref<4x8xf32, #tpu.memory_space<vmem>>, vector<4x8xf32>
    %cst = arith.constant dense<0.000000e+00> : vector<32x4xf32>
    %2 = tpu.matmul %0, %1, %cst {dimension_numbers = #tpu.dot_dimension_numbers<[1], [1], [0], [0], [0, 0, 1, 0], [], []>} : vector<32x8xf32>, vector<4x8xf32>, vector<32x4xf32> -> vector<32x4xf32>
    %c0_3 = arith.constant 0 : index
    %c0_4 = arith.constant 0 : index
    %3 = vector.load %arg3[%c0_3, %c0_4] : memref<32x1xf32, #tpu.memory_space<vmem>>, vector<32x1xf32>
    %4 = vector.broadcast %3 : vector<32x1xf32> to vector<32x4xf32>
    %5 = arith.addf %2, %4 : vector<32x4xf32>
    %cst_5 = arith.constant 2.000000e-01 : f32
    %6 = vector.broadcast %cst_5 : f32 to vector<32x4xf32>
    %7 = arith.mulf %6, %5 : vector<32x4xf32>
    %8 = arith.maximumf %5, %7 : vector<32x4xf32>
    %c0_6 = arith.constant 0 : index
    %c0_7 = arith.constant 0 : index
    %9 = vector.load %arg4[%c0_6, %c0_7] : memref<32x32xf32, #tpu.memory_space<vmem>>, vector<32x32xf32>
    %cst_8 = arith.constant dense<0.000000e+00> : vector<32x4xf32>
    %10 = tpu.matmul %9, %8, %cst_8 {dimension_numbers = #tpu.dot_dimension_numbers<[1], [0], [0], [1], [0, 0, 1, 1], [], []>} : vector<32x32xf32>, vector<32x4xf32>, vector<32x4xf32> -> vector<32x4xf32>
    %c0_9 = arith.constant 0 : index
    %c0_10 = arith.constant 0 : index
    %11 = vector.load %arg5[%c0_9, %c0_10] : memref<32x1xf32, #tpu.memory_space<vmem>>, vector<32x1xf32>
    %12 = vector.broadcast %11 : vector<32x1xf32> to vector<32x4xf32>
    %13 = arith.addf %10, %12 : vector<32x4xf32>
    %cst_11 = arith.constant 2.000000e-01 : f32
    %14 = vector.broadcast %cst_11 : f32 to vector<32x4xf32>
    %15 = arith.mulf %14, %13 : vector<32x4xf32>
    %16 = arith.maximumf %13, %15 : vector<32x4xf32>
    %c0_12 = arith.constant 0 : index
    %c0_13 = arith.constant 0 : index
    %17 = vector.load %arg6[%c0_12, %c0_13] : memref<4x32xf32, #tpu.memory_space<vmem>>, vector<4x32xf32>
    %cst_14 = arith.constant dense<0.000000e+00> : vector<4x4xf32>
    %18 = tpu.matmul %17, %16, %cst_14 {dimension_numbers = #tpu.dot_dimension_numbers<[1], [0], [0], [1], [0, 0, 1, 1], [], []>} : vector<4x32xf32>, vector<32x4xf32>, vector<4x4xf32> -> vector<4x4xf32>
    %c0_15 = arith.constant 0 : index
    %c0_16 = arith.constant 0 : index
    %19 = vector.load %arg7[%c0_15, %c0_16] : memref<4x1xf32, #tpu.memory_space<vmem>>, vector<4x1xf32>
    %20 = vector.broadcast %19 : vector<4x1xf32> to vector<4x4xf32>
    %21 = arith.addf %18, %20 : vector<4x4xf32>
    %c0_17 = arith.constant 0 : index
    %c0_18 = arith.constant 0 : index
    %22 = vector.load %arg8[%c0_17, %c0_18] : memref<4x4xf32, #tpu.memory_space<vmem>>, vector<4x4xf32>
    tpu.vector_store %arg8[%c0_17, %c0_18], %21 {strides = array<i32>} : memref<4x4xf32, #tpu.memory_space<vmem>>, vector<4x4xf32>,
    return
  }
  func.func @transform_0(%arg0: i32) -> (i32, i32) {
    %c0_i32 = arith.constant 0 : i32
    %c0_i32_0 = arith.constant 0 : i32
    return %arg0, %c0_i32 : i32, i32
  }
  func.func @transform_1(%arg0: i32) -> (i32, i32) {
    %c0_i32 = arith.constant 0 : i32
    %c0_i32_0 = arith.constant 0 : i32
    %c0_i32_1 = arith.constant 0 : i32
    return %c0_i32, %c0_i32_0 : i32, i32
  }
  func.func @transform_2(%arg0: i32) -> (i32, i32) {
    %c0_i32 = arith.constant 0 : i32
    %c0_i32_0 = arith.constant 0 : i32
    %c0_i32_1 = arith.constant 0 : i32
    return %c0_i32, %c0_i32_0 : i32, i32
  }
  func.func @transform_3(%arg0: i32) -> (i32, i32) {
    %c0_i32 = arith.constant 0 : i32
    %c0_i32_0 = arith.constant 0 : i32
    %c0_i32_1 = arith.constant 0 : i32
    return %c0_i32, %c0_i32_0 : i32, i32
  }
  func.func @transform_4(%arg0: i32) -> (i32, i32) {
    %c0_i32 = arith.constant 0 : i32
    %c0_i32_0 = arith.constant 0 : i32
    %c0_i32_1 = arith.constant 0 : i32
    return %c0_i32, %c0_i32_0 : i32, i32
  }
  func.func @transform_5(%arg0: i32) -> (i32, i32) {
    %c0_i32 = arith.constant 0 : i32
    %c0_i32_0 = arith.constant 0 : i32
    %c0_i32_1 = arith.constant 0 : i32
    return %c0_i32, %c0_i32_0 : i32, i32
  }
  func.func @transform_6(%arg0: i32) -> (i32, i32) {
    %c0_i32 = arith.constant 0 : i32
    %c0_i32_0 = arith.constant 0 : i32
    %c0_i32_1 = arith.constant 0 : i32
    return %c0_i32, %c0_i32_0 : i32, i32
  }
  func.func @transform_7(%arg0: i32) -> (i32, i32) {
    %c0_i32 = arith.constant 0 : i32
    %c0_i32_0 = arith.constant 0 : i32
    return %c0_i32, %arg0 : i32, i32
  }
}

</mosaic_0001>

<bundles_post_ra>
// kernel: tpu_custom_call.1
= control target key start
LH: loop header
LB: loop body
LE: loop exit
PB: predicated region body
PF: predicated region fallthrough
CT: control target
= control target key end

     0   :  { %vm56_vm0 = vcmask 64512   ;;  %v484_v4 = vmov 0   ;;  %s599_s0 = inlined_call_operand.vmem [shape: f32[4,8], index: 0, kind: input, shape index: {}]   ;;  %s600_s1 = inlined_call_operand.vmem [shape: f32[32,8], index: 1, kind: input, shape index: {}]   ;;  %s601_s2 = inlined_call_operand.vmem [shape: f32[32,1], index: 2, kind: input, shape index: {}]   ;;  %s602_s3 = inlined_call_operand.vmem [shape: f32[32,32], index: 3, kind: input, shape index: {}]   ;;  %s603_s4 = inlined_call_operand.vmem [shape: f32[32,1], index: 4, kind: input, shape index: {}]   ;;  %s604_s5 = inlined_call_operand.vmem [shape: f32[4,32], index: 5, kind: input, shape index: {}]   ;;  %s605_s6 = inlined_call_operand.vmem [shape: f32[4,1], index: 6, kind: input, shape index: {}]   ;;  %s606_s7 = inlined_call_operand.hbm [shape: f32[4,4], index: 7, kind: output, shape index: {}]  }
   0x1   :  { %v31_v0 = vld [vmem:[%s599_s0] sm:$0xf]  ;;  %v35_v2 = vld [vmem:[%s601_s2 + $0x18] sm:$0xff]  ;;  %v28_v3 = vld [vmem:[%s600_s1 + $0x8] sm:$0xff]  ;;  %460 = vset.pattern.permute.xlu0 %v484_v4  ;;  %461 = vset.pattern.permute.xlu1 %v484_v4 }
   0x2   :  { %v27_v1 = vld [vmem:[%s600_s1] sm:$0xff]  ;;  %423 = vmatprep.subr.msk.mxu0 %vm56_vm0, %v31_v0  ;;  %v33_v5 = vld [vmem:[%s601_s2 + $0x8] sm:$0xff]  ;;  %v29_v6 = vld [vmem:[%s600_s1 + $0x10] sm:$0xff]  ;;  %53 = vperm.xlu0 %460, %v35_v2  }
   0x3   :  { %425 = vmatprep.mubr.msk.f32.mxu0 %vm56_vm0, %v27_v1  ;;  %424 = vmatpush3.xpose.msk.msra.mxu0 %vm56_vm0, %v31_v0  ;;  %v34_v7 = vld [vmem:[%s601_s2 + $0x10] sm:$0xff] }
   0x4   :  { %43 = vperm.xlu1 %461, %v33_v5  }
   0x5   :  { %12 = vsyncpa [#allocation3], 0  ;;  %v32_v8 = vld [vmem:[%s601_s2] sm:$0xff]  ;;  %v30_v9 = vld [vmem:[%s600_s1 + $0x18] sm:$0xff]  ;;  %vm193_vm1 = vcmask 261120   ;;  %v485_v39 = vmov 0.0  }
   0x6   :  { %426 = vmatmul.mubr.msk.f32.vlgmr.msra.gmra.mxu0 %vm56_vm0, %v28_v3  ;;  %48 = vperm.xlu0 %460, %v34_v7   ;;  %v172_v10 = vld [vmem:[%s603_s4 + $0x18] sm:$0xff]  ;;  %v171_v11 = vld [vmem:[%s603_s4 + $0x10] sm:$0xff]  ;;  %v170_v12 = vld [vmem:[%s603_s4 + $0x8] sm:$0xff]  ;;  %vm486_vm2 = vmmov 0   ;;  %s487_s9 = smov [#allocation2]   ;;  %vm379_vm3 = vcmask 27648  }
   0x7   :  { %428 = vmatprep.mubr.msk.f32.mxu0 %vm56_vm0, %v29_v6  ;;  %v169_v13 = vld [vmem:[%s603_s4] sm:$0xff]  ;;  %v166_v36 = vld [vmem:[%s602_s3 + $0x8] sm:$0xff]  ;;  %v167_v37 = vld [vmem:[%s602_s3 + $0x10] sm:$0xff]  ;;  %445 = vmatprep.subr.mxu0 %v485_v39  ;;  %s387_s10 = sshll.u32 %s487_s9, 4  ;;  %s388_s10 = int_to_ptr.vmem [resolvable:$true] %s387_s10 }
   0x8   :  { %38 = vperm.xlu1 %461, %v32_v8   ;;  %v300_v14 = vld [vmem:[%s605_s6] sm:$0xf]  ;;  %v168_v38 = vld [vmem:[%s602_s3 + $0x18] sm:$0xff]  ;;  %s462_s11 = scalar_lea.vmem %s388_s10, 64  ;;  %p467_p1 = scmp.lt.s32.totalorder %s388_s10, %s388_s10 }
   0x9   :  { %v165_v15 = vld [vmem:[%s602_s3] sm:$0xff]  ;;  %p463_p0 = scmp.ne.s32.totalorder %s388_s10, %s462_s11  ;;  %p468_p2 = scmp.lt.s32.totalorder %s462_s11, %s462_s11 }
   0xa   :  { %429 = vmatmul.mubr.msk.f32.gmra.mxu0 %vm56_vm0, %v30_v9  ;;  %190 = vperm.xlu0 %460, %v172_v10   ;;  %v299_v60 = vld [vmem:[%s604_s5] sm:$0xf] }
   0xb   :  { %439 = vmatprep.mubr.msk.f32.mxu1 %vm193_vm1, %v165_v15  ;;  %453 = vmatprep.mubr.msk.f32.mxu0 %vm486_vm2, %v485_v39  ;;  %p469_p3 = por %p468_p2, %p467_p1 }
   0xc   :  { %185 = vperm.xlu1 %461, %v171_v11  }
   0xd   :  { %p470_p4 = pnand %p469_p3, %p463_p0 }
   0xe   :  { %180 = vperm.xlu0 %460, %v170_v12  }
  0x10   :  { %175 = vperm.xlu1 %461, %v169_v13  }
  0x12   :  { %303 = vperm.xlu0 %460, %v300_v14  }
  0x7d   :  { %v54_v16 = vpop.permute.xlu0 %53 }
  0x7f   :  { %v44_v17 = vpop.permute.xlu1 %43 }
  0x81   :  { %v49_v21 = vpop.permute.xlu0 %48 }
  0x83   :  { %v39_v24 = vpop.permute.xlu1 %38 }
  0x85   :  { %v191_v40 = vpop.permute.xlu0 %190 }
  0x87   :  { %v186_v41 = vpop.permute.xlu1 %185 }
  0x89   :  { %v181_v44 = vpop.permute.xlu0 %180 }
  0x8b   :  { %v176_v48 = vpop.permute.xlu1 %175 }
  0x8d   :  { %v304_v61 = vpop.permute.xlu0 %303 }
  0xc6   :  { %v427_v18 = vpop.f32.mrf.mxu0 }
  0xc7   :  { %v144_v22 = vadd.f32 %v427_v18, %v44_v17 }
  0xc8   :  { %v138_v19 = vpop.f32.mrf.mxu0 }
  0xc9   :  { %v139_v26 = vadd.f32 %v138_v19, %v39_v24  ;;  %v158_v29 = vmul.f32 0.2, %v144_v22 }
  0xca   :  { %v430_v20 = vpop.f32.mrf.mxu0 }
  0xcb   :  { %v154_v23 = vadd.f32 %v430_v20, %v54_v16  ;;  %v157_v32 = vmul.f32 0.2, %v139_v26  ;;  %v162_v34 = vmax.f32 %v144_v22, %v158_v29 }
  0xcc   :  { %v148_v25 = vpop.f32.mrf.mxu0 }
  0xcd   :  { %v160_v27 = vmul.f32 0.2, %v154_v23  ;;  %v149_v28 = vadd.f32 %v148_v25, %v49_v21  ;;  %v161_v35 = vmax.f32 %v139_v26, %v157_v32 }
  0xcf   :  { %v159_v30 = vmul.f32 0.2, %v149_v28  ;;  %v164_v31 = vmax.f32 %v154_v23, %v160_v27 }
  0xd1   :  { %v163_v33 = vmax.f32 %v149_v28, %v159_v30  ;;  %431 = vmatprep.subr.mxu1 %v164_v31 }
  0xd2   :  { %432 = vmatpush3.msra.mxu1 %v164_v31 }
  0xd3   :  { %433 = vmatprep.subr.mxu1 %v163_v33 }
  0xd4   :  { %434 = vmatpush3.msra.mxu1 %v163_v33 }
  0xd5   :  { %435 = vmatprep.subr.mxu1 %v162_v34 }
  0xd6   :  { %436 = vmatpush3.msra.mxu1 %v162_v34 }
  0xd7   :  { %437 = vmatprep.subr.mxu1 %v161_v35 }
  0xd8   :  { %438 = vmatpush3.msra.mxu1 %v161_v35 }
  0xd9   :  { %440 = vmatmul.mubr.msk.f32.vlgmr.msra.gmra.mxu1 %vm193_vm1, %v166_v36 }
  0xda   :  { %442 = vmatprep.mubr.msk.f32.mxu1 %vm193_vm1, %v167_v37 }
  0xdd   :  { %443 = vmatmul.mubr.msk.f32.gmra.mxu1 %vm193_vm1, %v168_v38 }
 0x199   :  { %v441_v42 = vpop.f32.mrf.mxu1 }
 0x19a   :  { %v278_v46 = vadd.f32 %v441_v42, %v181_v44 }
 0x19b   :  { %v272_v43 = vpop.f32.mrf.mxu1 }
 0x19c   :  { %v273_v50 = vadd.f32 %v272_v43, %v176_v48  ;;  %v292_v53 = vmul.f32 0.2, %v278_v46 }
 0x19d   :  { %v444_v45 = vpop.f32.mrf.mxu1 }
 0x19e   :  { %v288_v47 = vadd.f32 %v444_v45, %v191_v40  ;;  %v291_v56 = vmul.f32 0.2, %v273_v50  ;;  %v296_v58 = vmax.f32 %v278_v46, %v292_v53 }
 0x19f   :  { %v282_v49 = vpop.f32.mrf.mxu1 }
 0x1a0   :  { %v294_v51 = vmul.f32 0.2, %v288_v47  ;;  %v283_v52 = vadd.f32 %v282_v49, %v186_v41  ;;  %v295_v59 = vmax.f32 %v273_v50, %v291_v56 }
 0x1a2   :  { %v298_v54 = vmax.f32 %v288_v47, %v294_v51  ;;  %v293_v55 = vmul.f32 0.2, %v283_v52 }
 0x1a4   :  { %v297_v57 = vmax.f32 %v283_v52, %v293_v55  ;;  %446 = vmatpush3.msra.mxu0 %v298_v54 }
 0x1a5   :  { %447 = vmatprep.subr.mxu0 %v485_v39 }
 0x1a6   :  { %448 = vmatpush3.msra.mxu0 %v297_v57 }
 0x1a7   :  { %449 = vmatprep.subr.mxu0 %v485_v39 }
 0x1a8   :  { %450 = vmatpush3.msra.mxu0 %v296_v58 }
 0x1a9   :  { %451 = vmatprep.subr.mxu0 %v485_v39 }
 0x1aa   :  { %452 = vmatpush3.msra.mxu0 %v295_v59 }
 0x1ab   :  { %454 = vmatmul.mubr.msk.f32.vlgmr.msra.gmra.mxu0 %vm193_vm1, %v299_v60 }
 0x26b   :  { %v375_v62 = vpop.f32.mrf.mxu0 }
 0x26c   :  { %v376_v63 = vadd.f32 %v375_v62, %v304_v61 }
 0x26d   :  { %v455_v0 = vpop.f32.mrf.mxu0 }
 0x26e   :  { %380 = vst.msk [vmem:[#allocation2] sm:$0xf] %vm379_vm3, %v376_v63 }
 0x26f   :  { %473 = shalt.err (!%p470_p4)
}
 0x270   :  { %390 = dma.vmem_to_hbm [thread:$0]  %s388_s10, 64, %s606_s7, [#allocation3]  }
 0x271   :  { %482 = dma.done.wait [#allocation3], 64  }
 0x272   :  { %483 = vsyncadd [#allocation3], 4294967232 }
 0x273   :  { %394 = vsyncpa [#allocation3], 1 }

</bundles_post_ra>
